<compile_context>
chip_gen: v5e
topology: v5e:2x2
jax: 0.10.0
libtpu: 0.0.40
codegen_flags: <defaults>
</compile_context>

<pallas_src>
import jax
import jax.numpy as jnp
from jax import lax
from jax.experimental import pallas as pl
from jax.experimental.pallas import tpu as pltpu

_F32 = jnp.float32
_BF16 = jnp.bfloat16


def _sigmoid(x):
    return 1.0 / (1.0 + jnp.exp(-x))


def make_cglr_kernel(hp):
    N = hp["num_stock"]; F = hp["feature"]
    U = hp["rnn_unit"]; HID = hp["n_hid"]
    P = hp["num_path"]; K = hp["top_k"]; STEPS = hp["max_step"]
    WIN = hp["window_size"]; EPS = hp["epsilon"]

    def kernel(src_ref, adj_ref,
               w_tc_ref, b_tc_ref, v_att_ref,
               ln_g_ref, ln_b_ref,
               w_x_ref, b_x_ref,
               w_pfirst_ref, w_pblock_ref, mix_lanes_ref,
               w1b_ref, b_out1_ref,
               out_ref):
        f32 = _F32
        bf16 = _BF16

        # ---- First_module: TemporalChannelInteractionFusionModule --------
        # TODO(synk): original submodule source unavailable; stand-in =
        # channel interaction (linear F->U, tanh) + temporal attention over
        # the last `window_size` steps.  Only the window is DMA'd (sliced in
        # the wrapper), so no time mask is needed.
        src = src_ref[...]                                        # (WIN,N,F) bf16
        h2 = jnp.tanh(
            jnp.dot(src.reshape(WIN * N, F), w_tc_ref[...],
                    preferred_element_type=f32) + b_tc_ref[...])  # (WIN*N, U)
        # static row slices land on vreg boundaries when N % 8 == 0
        hs = [h2[t * N:(t + 1) * N, :] for t in range(WIN)]       # WIN x (N,U)

        v = v_att_ref[...]                                        # (1, U)
        # softmax over the window using lane-axis reductions only
        cols = [jnp.sum(hs[t] * v, axis=-1, keepdims=True) for t in range(WIN)]
        m = cols[0]
        for t in range(1, WIN):
            m = jnp.maximum(m, cols[t])
        es = [jnp.exp(c - m) for c in cols]
        denom = es[0]
        acc = es[0] * hs[0]
        for t in range(1, WIN):
            denom = denom + es[t]
            acc = acc + es[t] * hs[t]
        inv = pl.reciprocal(denom + 1e-8, approx=True)            # (N, 1)
        x = acc * inv                                             # (N, U)

        # ---- self.ln : LayerNorm over rnn_unit ----------------------------
        mu = jnp.mean(x, axis=-1, keepdims=True)
        var = jnp.mean((x - mu) ** 2, axis=-1, keepdims=True)
        x = ln_g_ref[...] * (x - mu) / jnp.sqrt(var + 1e-5) + ln_b_ref[...]
        x_b = x.astype(bf16)

        # ---- one fused projection from x ----------------------------------
        # columns: [relation proj | graph input proj | out_1 (x half) | gate]
        y = (jnp.dot(x_b, w_x_ref[...], preferred_element_type=f32)
             + b_x_ref[...])                                      # (N, 3*HID+P)
        z = jnp.maximum(y[:, 0:HID], 0.0)                         # relation
        H0 = jnp.maximum(y[:, HID:2 * HID], 0.0)                  # graph input
        l1a = y[:, 2 * HID:3 * HID]                               # out_1 @ x
        glogits = y[:, 3 * HID:3 * HID + P]                       # routing gate

        # ---- second_module: NoiseAwareRelationInference -------------------
        # TODO(synk): stand-in = projected similarity with epsilon-gated
        # row-normalized relation matrix.  bf16 operands, f32 accumulation.
        z_b = z.astype(bf16)
        s = lax.dot_general(z_b, z_b, (((1,), (1,)), ((), ())),
                            preferred_element_type=f32) / jnp.sqrt(float(HID))
        gate_rel = _sigmoid(s - EPS)
        A = gate_rel / (jnp.sum(gate_rel, axis=-1, keepdims=True) + 1e-8)

        # ---- F.dropout(new_src_seq) : identity at inference ---------------

        # ---- cgrn: ConditionGraphRoutingNetwork ----------------------------
        # TODO(synk): stand-in = per-path mix of static matrix and inferred
        # relation, max_step propagation hops, top_k softmax path routing.
        # All P paths are packed along lanes (N, P*HID), the static matrix and
        # inferred relation are stacked along sublanes (2N, N) so each hop is
        # exactly two full-width matmuls; the distributive form
        # mp*(Mn@X) + (1-mp)*(A@X) avoids materializing any per-path Ap.
        Mrow = adj_ref[...].astype(f32)
        Mn = Mrow / (jnp.sum(jnp.abs(Mrow), axis=-1, keepdims=True) + 1e-8)
        MA_b = jnp.concatenate([Mn, A], axis=0).astype(bf16)      # (2N, N)

        mixvec = _sigmoid(mix_lanes_ref[...])                     # (1, P*HID)
        inv_mixvec = 1.0 - mixvec

        if STEPS >= 1:
            Xb = jnp.dot(H0.astype(bf16), w_pfirst_ref[...],
                         preferred_element_type=f32).astype(bf16)  # (N, P*HID)
            Y = jnp.dot(MA_b, Xb, preferred_element_type=f32)      # (2N, P*HID)
            Hp = jnp.maximum(mixvec * Y[:N, :] + inv_mixvec * Y[N:, :], 0.0)
            for _ in range(STEPS - 1):
                Xb = jnp.dot(Hp.astype(bf16), w_pblock_ref[...],
                             preferred_element_type=f32).astype(bf16)
                Y = jnp.dot(MA_b, Xb, preferred_element_type=f32)
                Hp = jnp.maximum(mixvec * Y[:N, :] + inv_mixvec * Y[N:, :], 0.0)
        else:
            Hp = jnp.concatenate([H0] * P, axis=1)

        # top_k softmax routing over the P paths
        cur = glogits
        thr = jnp.max(cur, axis=-1, keepdims=True)
        for _ in range(K - 1):
            cur = jnp.where(cur >= thr, -1e30, cur)
            thr = jnp.max(cur, axis=-1, keepdims=True)
        topk_mask = glogits >= thr
        masked = jnp.where(topk_mask, glogits, -1e30)
        masked = masked - jnp.max(masked, axis=-1, keepdims=True)
        e = jnp.exp(masked) * topk_mask.astype(f32)
        route = e / (jnp.sum(e, axis=-1, keepdims=True) + 1e-8)   # (N, P)

        H = route[:, 0:1] * Hp[:, 0:HID]
        for p in range(1, P):
            H = H + route[:, p:p + 1] * Hp[:, p * HID:(p + 1) * HID]  # (N,HID)

        # ---- head: cat([new_src_seq, H], 1) -> out_1 -> ELU ----------------
        # concat avoided: the x-half of out_1 is already in l1a (fused above);
        # the tiny (HID, n_class=1) out_2 projection is done lane-dense in the
        # XLA wrapper so the kernel writeback stays unmasked-wide.
        l1 = (l1a
              + jnp.dot(H.astype(bf16), w1b_ref[...],
                        preferred_element_type=f32)
              + b_out1_ref[...])
        l1 = jnp.where(l1 > 0.0, l1, jnp.exp(jnp.minimum(l1, 0.0)) - 1.0)  # ELU
        out_ref[...] = l1.astype(out_ref.dtype)

    return kernel


def init_params(key, hp):
    F = hp["feature"]; U = hp["rnn_unit"]; HID = hp["n_hid"]
    C = hp["n_class"]; P = hp["num_path"]
    ks = jax.random.split(key, 9)

    def dense(k, fan_in, shape):
        return jax.random.normal(k, shape, _F32) / jnp.sqrt(float(fan_in))

    w_tc = dense(ks[0], F, (F, U));           b_tc = jnp.zeros((1, U), _F32)
    v_att = dense(ks[1], U, (1, U))
    ln_g = jnp.ones((1, U), _F32);            ln_b = jnp.zeros((1, U), _F32)
    w_r = dense(ks[2], U, (U, HID));          b_r = jnp.zeros((1, HID), _F32)
    w_in = dense(ks[3], U, (U, HID));         b_in = jnp.zeros((1, HID), _F32)
    w_path = dense(ks[4], HID, (P, HID, HID))
    path_mix = dense(ks[5], 1, (1, P))
    w_gate = dense(ks[6], U, (U, P));         b_gate = jnp.zeros((1, P), _F32)
    w_out1 = dense(ks[7], U + HID, (U + HID, HID))
    b_out1 = jnp.zeros((1, HID), _F32)
    w_out2 = dense(ks[8], HID, (HID, C));     b_out2 = jnp.zeros((1, C), _F32)
    return (w_tc, b_tc, v_att, ln_g, ln_b, w_r, b_r, w_in, b_in,
            w_path, path_mix, w_gate, b_gate, w_out1, b_out1, w_out2, b_out2)


def _vmem_limit_bytes():
    # generation-aware scoped-VMEM ceiling (128 MiB v5e/v6e, 64 MiB v7x)
    try:
        cap = int(pltpu.get_tpu_info().vmem_capacity_bytes)
        return min(cap * 3 // 4, 100 * 1024 * 1024)
    except Exception:
        return 32 * 1024 * 1024


def cglr_forward(src_seq1, matrix, matrix2, params, hp):
    del matrix2  # matrix2 is accepted but unused in the reference forward
    T = hp["seq_len"]; N = hp["num_stock"]
    U = hp["rnn_unit"]; HID = hp["n_hid"]
    P = hp["num_path"]; WIN = hp["window_size"]

    (w_tc, b_tc, v_att, ln_g, ln_b, w_r, b_r, w_in, b_in,
     w_path, path_mix, w_gate, b_gate, w_out1, b_out1, w_out2, b_out2) = params

    # ---- call-boundary (XLA) layout plumbing, all one-time ----------------
    # only the attention window is DMA'd into the kernel, in bf16
    src_win = lax.slice_in_dim(src_seq1, T - WIN, T, axis=0).astype(_BF16)
    # fuse every projection that consumes x into one lane-packed weight:
    # [relation proj | graph input proj | out_1 (x half) | routing gate]
    w_x_fused = jnp.concatenate(
        [w_r, w_in, w_out1[:U, :], w_gate], axis=1).astype(_BF16)   # (U,3H+P)
    b_x_fused = jnp.concatenate(
        [b_r, b_in, jnp.zeros((1, HID), _F32), b_gate], axis=1)     # (1,3H+P)
    # out_1 weight half that consumes H (no in-kernel ref slicing / concat)
    w1b = w_out1[U:U + HID, :].astype(_BF16)
    # paths packed along lanes: first-hop weight (HID, P*HID) and
    # block-diagonal per-hop weight (P*HID, P*HID)
    w_pfirst = jnp.concatenate([w_path[p] for p in range(P)],
                               axis=1).astype(_BF16)
    w_pblock = jax.scipy.linalg.block_diag(
        *[w_path[p] for p in range(P)]).astype(_BF16)
    # per-path mix replicated across each HID-lane group (pre-sigmoid)
    mix_lanes = jnp.repeat(path_mix, HID, axis=1)                   # (1, P*HID)

    inputs = (src_win, matrix,
              w_tc.astype(_BF16), b_tc, v_att, ln_g, ln_b,
              w_x_fused, b_x_fused,
              w_pfirst, w_pblock, mix_lanes,
              w1b, b_out1)

    kernel = make_cglr_kernel(hp)
    vmem_specs = [pl.BlockSpec(memory_space=pltpu.MemorySpace.VMEM)
                  for _ in inputs]
    # TODO(synk): for multi-sample batches, add a leading "parallel" grid
    # axis so both v7x TensorCores are used and src DMA pipelines across
    # samples; the reference forward is single-sample, so grid=() here.
    l1 = pl.pallas_call(
        kernel,
        out_shape=jax.ShapeDtypeStruct((N, HID), _F32),
        in_specs=vmem_specs,
        out_specs=pl.BlockSpec(memory_space=pltpu.MemorySpace.VMEM),
        compiler_params=pltpu.CompilerParams(
            vmem_limit_bytes=_vmem_limit_bytes()),
    )(*inputs)

    # final (HID, n_class) projection kept outside the kernel so the kernel
    # writeback stays lane-dense (n_class=1 would force masked 1-lane stores)
    return jnp.dot(l1, w_out2) + b_out2


if __name__ == "__main__":
    hp = dict(seq_len=8, num_stock=8, feature=4,
              rnn_unit=32, n_hid=32, n_class=1,
              num_path=4, top_k=2, max_step=2, window_size=4,
              epsilon=1.0, dropout=0.1)

    key = jax.random.PRNGKey(0)
    k_src, k_adj, k_adj2, k_par = jax.random.split(key, 4)
    T, N, F = hp["seq_len"], hp["num_stock"], hp["feature"]

    src_seq1 = jax.random.normal(k_src, (T, N, F), jnp.float32)
    matrix = (jax.random.uniform(k_adj, (N, N)) > 0.5).astype(jnp.float32)
    matrix = matrix + jnp.eye(N, dtype=jnp.float32)
    matrix2 = jax.random.uniform(k_adj2, (N, N), dtype=jnp.float32)  # unused

    params = init_params(k_par, hp)

    out = cglr_forward(src_seq1, matrix, matrix2, params, hp)
    out = jax.block_until_ready(out)
    assert out.shape == (N, hp["n_class"]), out.shape
    assert bool(jnp.all(jnp.isfinite(out)))
    print("KERNEL_OK")
</pallas_src>

<mosaic_0001>
module attributes {stable_mosaic.version = 11 : i64} {
  func.func @kernel(%arg0: memref<4x8x4xbf16, #tpu.memory_space<vmem>>, %arg1: memref<8x8xf32, #tpu.memory_space<vmem>>, %arg2: memref<4x32xbf16, #tpu.memory_space<vmem>>, %arg3: memref<1x32xf32, #tpu.memory_space<vmem>>, %arg4: memref<1x32xf32, #tpu.memory_space<vmem>>, %arg5: memref<1x32xf32, #tpu.memory_space<vmem>>, %arg6: memref<1x32xf32, #tpu.memory_space<vmem>>, %arg7: memref<32x100xbf16, #tpu.memory_space<vmem>>, %arg8: memref<1x100xf32, #tpu.memory_space<vmem>>, %arg9: memref<32x128xbf16, #tpu.memory_space<vmem>>, %arg10: memref<128x128xbf16, #tpu.memory_space<vmem>>, %arg11: memref<1x128xf32, #tpu.memory_space<vmem>>, %arg12: memref<32x32xbf16, #tpu.memory_space<vmem>>, %arg13: memref<1x32xf32, #tpu.memory_space<vmem>>, %arg14: memref<8x32xf32, #tpu.memory_space<vmem>>) attributes {dimension_semantics = [], scalar_prefetch = 0 : i64, scratch_operands = 0 : i64, tpu.core_type = #tpu.core_type<tc>} {
    %c0 = arith.constant 0 : index
    %c0_0 = arith.constant 0 : index
    %c0_1 = arith.constant 0 : index
    %0 = vector.load %arg0[%c0, %c0_0, %c0_1] : memref<4x8x4xbf16, #tpu.memory_space<vmem>>, vector<4x8x4xbf16>
    %1 = vector.shape_cast %0 : vector<4x8x4xbf16> to vector<32x4xbf16>
    %c0_2 = arith.constant 0 : index
    %c0_3 = arith.constant 0 : index
    %2 = vector.load %arg2[%c0_2, %c0_3] : memref<4x32xbf16, #tpu.memory_space<vmem>>, vector<4x32xbf16>
    %cst = arith.constant dense<0.000000e+00> : vector<32x32xf32>
    %3 = tpu.matmul %1, %2, %cst {dimension_numbers = #tpu.dot_dimension_numbers<[1], [0], [0], [1], [0, 0, 1, 1], [], []>} : vector<32x4xbf16>, vector<4x32xbf16>, vector<32x32xf32> -> vector<32x32xf32>
    %c0_4 = arith.constant 0 : index
    %c0_5 = arith.constant 0 : index
    %4 = vector.load %arg3[%c0_4, %c0_5] : memref<1x32xf32, #tpu.memory_space<vmem>>, vector<1x32xf32>
    %5 = vector.broadcast %4 : vector<1x32xf32> to vector<32x32xf32>
    %6 = arith.addf %3, %5 : vector<32x32xf32>
    %7 = math.tanh %6 : vector<32x32xf32>
    %8 = vector.extract_strided_slice %7 {offsets = [0, 0], sizes = [8, 32], strides = [1, 1]} : vector<32x32xf32> to vector<8x32xf32>
    %9 = vector.extract_strided_slice %7 {offsets = [8, 0], sizes = [8, 32], strides = [1, 1]} : vector<32x32xf32> to vector<8x32xf32>
    %10 = vector.extract_strided_slice %7 {offsets = [16, 0], sizes = [8, 32], strides = [1, 1]} : vector<32x32xf32> to vector<8x32xf32>
    %11 = vector.extract_strided_slice %7 {offsets = [24, 0], sizes = [8, 32], strides = [1, 1]} : vector<32x32xf32> to vector<8x32xf32>
    %c0_6 = arith.constant 0 : index
    %c0_7 = arith.constant 0 : index
    %12 = vector.load %arg4[%c0_6, %c0_7] : memref<1x32xf32, #tpu.memory_space<vmem>>, vector<1x32xf32>
    %13 = vector.broadcast %12 : vector<1x32xf32> to vector<8x32xf32>
    %14 = arith.mulf %8, %13 : vector<8x32xf32>
    %cst_8 = arith.constant dense<0.000000e+00> : vector<8xf32>
    %15 = vector.multi_reduction <add>, %14, %cst_8 [1] : vector<8x32xf32> to vector<8xf32>
    %16 = vector.shape_cast %15 : vector<8xf32> to vector<8x1xf32>
    %17 = vector.broadcast %12 : vector<1x32xf32> to vector<8x32xf32>
    %18 = arith.mulf %9, %17 : vector<8x32xf32>
    %cst_9 = arith.constant dense<0.000000e+00> : vector<8xf32>
    %19 = vector.multi_reduction <add>, %18, %cst_9 [1] : vector<8x32xf32> to vector<8xf32>
    %20 = vector.shape_cast %19 : vector<8xf32> to vector<8x1xf32>
    %21 = vector.broadcast %12 : vector<1x32xf32> to vector<8x32xf32>
    %22 = arith.mulf %10, %21 : vector<8x32xf32>
    %cst_10 = arith.constant dense<0.000000e+00> : vector<8xf32>
    %23 = vector.multi_reduction <add>, %22, %cst_10 [1] : vector<8x32xf32> to vector<8xf32>
    %24 = vector.shape_cast %23 : vector<8xf32> to vector<8x1xf32>
    %25 = vector.broadcast %12 : vector<1x32xf32> to vector<8x32xf32>
    %26 = arith.mulf %11, %25 : vector<8x32xf32>
    %cst_11 = arith.constant dense<0.000000e+00> : vector<8xf32>
    %27 = vector.multi_reduction <add>, %26, %cst_11 [1] : vector<8x32xf32> to vector<8xf32>
    %28 = vector.shape_cast %27 : vector<8xf32> to vector<8x1xf32>
    %29 = arith.maximumf %16, %20 : vector<8x1xf32>
    %30 = arith.maximumf %29, %24 : vector<8x1xf32>
    %31 = arith.maximumf %30, %28 : vector<8x1xf32>
    %32 = arith.subf %16, %31 : vector<8x1xf32>
    %33 = math.exp %32 : vector<8x1xf32>
    %34 = arith.subf %20, %31 : vector<8x1xf32>
    %35 = math.exp %34 : vector<8x1xf32>
    %36 = arith.subf %24, %31 : vector<8x1xf32>
    %37 = math.exp %36 : vector<8x1xf32>
    %38 = arith.subf %28, %31 : vector<8x1xf32>
    %39 = math.exp %38 : vector<8x1xf32>
    %40 = vector.broadcast %33 : vector<8x1xf32> to vector<8x32xf32>
    %41 = arith.mulf %40, %8 : vector<8x32xf32>
    %42 = arith.addf %33, %35 : vector<8x1xf32>
    %43 = vector.broadcast %35 : vector<8x1xf32> to vector<8x32xf32>
    %44 = arith.mulf %43, %9 : vector<8x32xf32>
    %45 = arith.addf %41, %44 : vector<8x32xf32>
    %46 = arith.addf %42, %37 : vector<8x1xf32>
    %47 = vector.broadcast %37 : vector<8x1xf32> to vector<8x32xf32>
    %48 = arith.mulf %47, %10 : vector<8x32xf32>
    %49 = arith.addf %45, %48 : vector<8x32xf32>
    %50 = arith.addf %46, %39 : vector<8x1xf32>
    %51 = vector.broadcast %39 : vector<8x1xf32> to vector<8x32xf32>
    %52 = arith.mulf %51, %11 : vector<8x32xf32>
    %53 = arith.addf %49, %52 : vector<8x32xf32>
    %cst_12 = arith.constant 9.99999993E-9 : f32
    %54 = vector.broadcast %cst_12 : f32 to vector<8x1xf32>
    %55 = arith.addf %50, %54 : vector<8x1xf32>
    %56 = tpu.reciprocal %55 {approx = true} : vector<8x1xf32> -> vector<8x1xf32>
    %57 = vector.broadcast %56 : vector<8x1xf32> to vector<8x32xf32>
    %58 = arith.mulf %53, %57 : vector<8x32xf32>
    %cst_13 = arith.constant dense<0.000000e+00> : vector<8xf32>
    %59 = vector.multi_reduction <add>, %58, %cst_13 [1] : vector<8x32xf32> to vector<8xf32>
    %60 = vector.shape_cast %59 : vector<8xf32> to vector<8x1xf32>
    %cst_14 = arith.constant 3.200000e+01 : f32
    %61 = vector.broadcast %cst_14 : f32 to vector<8x1xf32>
    %62 = arith.divf %60, %61 : vector<8x1xf32>
    %63 = vector.broadcast %62 : vector<8x1xf32> to vector<8x32xf32>
    %64 = arith.subf %58, %63 : vector<8x32xf32>
    %65 = arith.mulf %64, %64 : vector<8x32xf32>
    %cst_15 = arith.constant dense<0.000000e+00> : vector<8xf32>
    %66 = vector.multi_reduction <add>, %65, %cst_15 [1] : vector<8x32xf32> to vector<8xf32>
    %67 = vector.shape_cast %66 : vector<8xf32> to vector<8x1xf32>
    %cst_16 = arith.constant 3.200000e+01 : f32
    %68 = vector.broadcast %cst_16 : f32 to vector<8x1xf32>
    %69 = arith.divf %67, %68 : vector<8x1xf32>
    %c0_17 = arith.constant 0 : index
    %c0_18 = arith.constant 0 : index
    %70 = vector.load %arg5[%c0_17, %c0_18] : memref<1x32xf32, #tpu.memory_space<vmem>>, vector<1x32xf32>
    %71 = vector.broadcast %62 : vector<8x1xf32> to vector<8x32xf32>
    %72 = arith.subf %58, %71 : vector<8x32xf32>
    %73 = vector.broadcast %70 : vector<1x32xf32> to vector<8x32xf32>
    %74 = arith.mulf %73, %72 : vector<8x32xf32>
    %cst_19 = arith.constant 9.99999974E-6 : f32
    %75 = vector.broadcast %cst_19 : f32 to vector<8x1xf32>
    %76 = arith.addf %69, %75 : vector<8x1xf32>
    %77 = math.sqrt %76 : vector<8x1xf32>
    %78 = vector.broadcast %77 : vector<8x1xf32> to vector<8x32xf32>
    %79 = arith.divf %74, %78 : vector<8x32xf32>
    %c0_20 = arith.constant 0 : index
    %c0_21 = arith.constant 0 : index
    %80 = vector.load %arg6[%c0_20, %c0_21] : memref<1x32xf32, #tpu.memory_space<vmem>>, vector<1x32xf32>
    %81 = vector.broadcast %80 : vector<1x32xf32> to vector<8x32xf32>
    %82 = arith.addf %79, %81 : vector<8x32xf32>
    %83 = arith.truncf %82 : vector<8x32xf32> to vector<8x32xbf16>
    %c0_22 = arith.constant 0 : index
    %c0_23 = arith.constant 0 : index
    %84 = vector.load %arg7[%c0_22, %c0_23] : memref<32x100xbf16, #tpu.memory_space<vmem>>, vector<32x100xbf16>
    %cst_24 = arith.constant dense<0.000000e+00> : vector<8x100xf32>
    %85 = tpu.matmul %83, %84, %cst_24 {dimension_numbers = #tpu.dot_dimension_numbers<[1], [0], [0], [1], [0, 0, 1, 1], [], []>} : vector<8x32xbf16>, vector<32x100xbf16>, vector<8x100xf32> -> vector<8x100xf32>
    %c0_25 = arith.constant 0 : index
    %c0_26 = arith.constant 0 : index
    %86 = vector.load %arg8[%c0_25, %c0_26] : memref<1x100xf32, #tpu.memory_space<vmem>>, vector<1x100xf32>
    %87 = vector.broadcast %86 : vector<1x100xf32> to vector<8x100xf32>
    %88 = arith.addf %85, %87 : vector<8x100xf32>
    %89 = vector.extract_strided_slice %88 {offsets = [0, 0], sizes = [8, 32], strides = [1, 1]} : vector<8x100xf32> to vector<8x32xf32>
    %cst_27 = arith.constant 0.000000e+00 : f32
    %90 = vector.broadcast %cst_27 : f32 to vector<8x32xf32>
    %91 = arith.maximumf %89, %90 : vector<8x32xf32>
    %92 = vector.extract_strided_slice %88 {offsets = [0, 32], sizes = [8, 32], strides = [1, 1]} : vector<8x100xf32> to vector<8x32xf32>
    %cst_28 = arith.constant 0.000000e+00 : f32
    %93 = vector.broadcast %cst_28 : f32 to vector<8x32xf32>
    %94 = arith.maximumf %92, %93 : vector<8x32xf32>
    %95 = vector.extract_strided_slice %88 {offsets = [0, 64], sizes = [8, 32], strides = [1, 1]} : vector<8x100xf32> to vector<8x32xf32>
    %96 = vector.extract_strided_slice %88 {offsets = [0, 96], sizes = [8, 4], strides = [1, 1]} : vector<8x100xf32> to vector<8x4xf32>
    %97 = arith.truncf %91 : vector<8x32xf32> to vector<8x32xbf16>
    %cst_29 = arith.constant dense<0.000000e+00> : vector<8x8xf32>
    %98 = tpu.matmul %97, %97, %cst_29 {dimension_numbers = #tpu.dot_dimension_numbers<[1], [1], [0], [0], [0, 0, 1, 0], [], []>} : vector<8x32xbf16>, vector<8x32xbf16>, vector<8x8xf32> -> vector<8x8xf32>
    %cst_30 = arith.constant 3.200000e+01 : f32
    %99 = math.sqrt %cst_30 : f32
    %100 = vector.broadcast %99 : f32 to vector<8x8xf32>
    %101 = arith.divf %98, %100 : vector<8x8xf32>
    %cst_31 = arith.constant 1.000000e+00 : f32
    %102 = vector.broadcast %cst_31 : f32 to vector<8x8xf32>
    %103 = arith.subf %101, %102 : vector<8x8xf32>
    %cst_32 = arith.constant 0.000000e+00 : f32
    %104 = vector.broadcast %cst_32 : f32 to vector<8x8xf32>
    %105 = arith.subf %104, %103 : vector<8x8xf32>
    %106 = math.exp %105 : vector<8x8xf32>
    %cst_33 = arith.constant 1.000000e+00 : f32
    %107 = vector.broadcast %cst_33 : f32 to vector<8x8xf32>
    %108 = arith.addf %107, %106 : vector<8x8xf32>
    %cst_34 = arith.constant 1.000000e+00 : f32
    %109 = vector.broadcast %cst_34 : f32 to vector<8x8xf32>
    %110 = arith.divf %109, %108 : vector<8x8xf32>
    %cst_35 = arith.constant dense<0.000000e+00> : vector<8xf32>
    %111 = vector.multi_reduction <add>, %110, %cst_35 [1] : vector<8x8xf32> to vector<8xf32>
    %112 = vector.shape_cast %111 : vector<8xf32> to vector<8x1xf32>
    %cst_36 = arith.constant 9.99999993E-9 : f32
    %113 = vector.broadcast %cst_36 : f32 to vector<8x1xf32>
    %114 = arith.addf %112, %113 : vector<8x1xf32>
    %115 = vector.broadcast %114 : vector<8x1xf32> to vector<8x8xf32>
    %116 = arith.divf %110, %115 : vector<8x8xf32>
    %c0_37 = arith.constant 0 : index
    %c0_38 = arith.constant 0 : index
    %117 = vector.load %arg1[%c0_37, %c0_38] : memref<8x8xf32, #tpu.memory_space<vmem>>, vector<8x8xf32>
    %118 = math.absf %117 : vector<8x8xf32>
    %cst_39 = arith.constant dense<0.000000e+00> : vector<8xf32>
    %119 = vector.multi_reduction <add>, %118, %cst_39 [1] : vector<8x8xf32> to vector<8xf32>
    %120 = vector.shape_cast %119 : vector<8xf32> to vector<8x1xf32>
    %cst_40 = arith.constant 9.99999993E-9 : f32
    %121 = vector.broadcast %cst_40 : f32 to vector<8x1xf32>
    %122 = arith.addf %120, %121 : vector<8x1xf32>
    %123 = vector.broadcast %122 : vector<8x1xf32> to vector<8x8xf32>
    %124 = arith.divf %117, %123 : vector<8x8xf32>
    %125 = tpu.concatenate %124, %116 in 0 : vector<8x8xf32>, vector<8x8xf32> -> vector<16x8xf32>
    %126 = arith.truncf %125 : vector<16x8xf32> to vector<16x8xbf16>
    %c0_41 = arith.constant 0 : index
    %c0_42 = arith.constant 0 : index
    %127 = vector.load %arg11[%c0_41, %c0_42] : memref<1x128xf32, #tpu.memory_space<vmem>>, vector<1x128xf32>
    %cst_43 = arith.constant 0.000000e+00 : f32
    %128 = vector.broadcast %cst_43 : f32 to vector<1x128xf32>
    %129 = arith.subf %128, %127 : vector<1x128xf32>
    %130 = math.exp %129 : vector<1x128xf32>
    %cst_44 = arith.constant 1.000000e+00 : f32
    %131 = vector.broadcast %cst_44 : f32 to vector<1x128xf32>
    %132 = arith.addf %131, %130 : vector<1x128xf32>
    %cst_45 = arith.constant 1.000000e+00 : f32
    %133 = vector.broadcast %cst_45 : f32 to vector<1x128xf32>
    %134 = arith.divf %133, %132 : vector<1x128xf32>
    %cst_46 = arith.constant 1.000000e+00 : f32
    %135 = vector.broadcast %cst_46 : f32 to vector<1x128xf32>
    %136 = arith.subf %135, %134 : vector<1x128xf32>
    %137 = arith.truncf %94 : vector<8x32xf32> to vector<8x32xbf16>
    %c0_47 = arith.constant 0 : index
    %c0_48 = arith.constant 0 : index
    %138 = vector.load %arg9[%c0_47, %c0_48] : memref<32x128xbf16, #tpu.memory_space<vmem>>, vector<32x128xbf16>
    %cst_49 = arith.constant dense<0.000000e+00> : vector<8x128xf32>
    %139 = tpu.matmul %137, %138, %cst_49 {dimension_numbers = #tpu.dot_dimension_numbers<[1], [0], [0], [1], [0, 0, 1, 1], [], []>} : vector<8x32xbf16>, vector<32x128xbf16>, vector<8x128xf32> -> vector<8x128xf32>
    %140 = arith.truncf %139 : vector<8x128xf32> to vector<8x128xbf16>
    %cst_50 = arith.constant dense<0.000000e+00> : vector<16x128xf32>
    %141 = tpu.matmul %126, %140, %cst_50 {dimension_numbers = #tpu.dot_dimension_numbers<[1], [0], [0], [1], [0, 0, 1, 1], [], []>} : vector<16x8xbf16>, vector<8x128xbf16>, vector<16x128xf32> -> vector<16x128xf32>
    %142 = vector.extract_strided_slice %141 {offsets = [0, 0], sizes = [8, 128], strides = [1, 1]} : vector<16x128xf32> to vector<8x128xf32>
    %143 = vector.broadcast %134 : vector<1x128xf32> to vector<8x128xf32>
    %144 = arith.mulf %143, %142 : vector<8x128xf32>
    %145 = vector.extract_strided_slice %141 {offsets = [8, 0], sizes = [8, 128], strides = [1, 1]} : vector<16x128xf32> to vector<8x128xf32>
    %146 = vector.broadcast %136 : vector<1x128xf32> to vector<8x128xf32>
    %147 = arith.mulf %146, %145 : vector<8x128xf32>
    %148 = arith.addf %144, %147 : vector<8x128xf32>
    %cst_51 = arith.constant 0.000000e+00 : f32
    %149 = vector.broadcast %cst_51 : f32 to vector<8x128xf32>
    %150 = arith.maximumf %148, %149 : vector<8x128xf32>
    %151 = arith.truncf %150 : vector<8x128xf32> to vector<8x128xbf16>
    %c0_52 = arith.constant 0 : index
    %c0_53 = arith.constant 0 : index
    %152 = vector.load %arg10[%c0_52, %c0_53] : memref<128x128xbf16, #tpu.memory_space<vmem>>, vector<128x128xbf16>
    %cst_54 = arith.constant dense<0.000000e+00> : vector<8x128xf32>
    %153 = tpu.matmul %151, %152, %cst_54 {dimension_numbers = #tpu.dot_dimension_numbers<[1], [0], [0], [1], [0, 0, 1, 1], [], []>} : vector<8x128xbf16>, vector<128x128xbf16>, vector<8x128xf32> -> vector<8x128xf32>
    %154 = arith.truncf %153 : vector<8x128xf32> to vector<8x128xbf16>
    %cst_55 = arith.constant dense<0.000000e+00> : vector<16x128xf32>
    %155 = tpu.matmul %126, %154, %cst_55 {dimension_numbers = #tpu.dot_dimension_numbers<[1], [0], [0], [1], [0, 0, 1, 1], [], []>} : vector<16x8xbf16>, vector<8x128xbf16>, vector<16x128xf32> -> vector<16x128xf32>
    %156 = vector.extract_strided_slice %155 {offsets = [0, 0], sizes = [8, 128], strides = [1, 1]} : vector<16x128xf32> to vector<8x128xf32>
    %157 = vector.broadcast %134 : vector<1x128xf32> to vector<8x128xf32>
    %158 = arith.mulf %157, %156 : vector<8x128xf32>
    %159 = vector.extract_strided_slice %155 {offsets = [8, 0], sizes = [8, 128], strides = [1, 1]} : vector<16x128xf32> to vector<8x128xf32>
    %160 = vector.broadcast %136 : vector<1x128xf32> to vector<8x128xf32>
    %161 = arith.mulf %160, %159 : vector<8x128xf32>
    %162 = arith.addf %158, %161 : vector<8x128xf32>
    %cst_56 = arith.constant 0.000000e+00 : f32
    %163 = vector.broadcast %cst_56 : f32 to vector<8x128xf32>
    %164 = arith.maximumf %162, %163 : vector<8x128xf32>
    %cst_57 = arith.constant dense<0xFF800000> : vector<8xf32>
    %165 = vector.multi_reduction <maximumf>, %96, %cst_57 [1] : vector<8x4xf32> to vector<8xf32>
    %166 = vector.shape_cast %165 : vector<8xf32> to vector<8x1xf32>
    %167 = vector.broadcast %166 : vector<8x1xf32> to vector<8x4xf32>
    %168 = arith.cmpf oge, %96, %167 : vector<8x4xf32>
    %cst_58 = arith.constant -1.000000e+30 : f32
    %169 = vector.broadcast %cst_58 : f32 to vector<8x4xf32>
    %170 = arith.select %168, %169, %96 : vector<8x4xi1>, vector<8x4xf32>
    %cst_59 = arith.constant dense<0xFF800000> : vector<8xf32>
    %171 = vector.multi_reduction <maximumf>, %170, %cst_59 [1] : vector<8x4xf32> to vector<8xf32>
    %172 = vector.shape_cast %171 : vector<8xf32> to vector<8x1xf32>
    %173 = vector.broadcast %172 : vector<8x1xf32> to vector<8x4xf32>
    %174 = arith.cmpf oge, %96, %173 : vector<8x4xf32>
    %cst_60 = arith.constant -1.000000e+30 : f32
    %175 = vector.broadcast %cst_60 : f32 to vector<8x4xf32>
    %176 = arith.select %174, %96, %175 : vector<8x4xi1>, vector<8x4xf32>
    %cst_61 = arith.constant dense<0xFF800000> : vector<8xf32>
    %177 = vector.multi_reduction <maximumf>, %176, %cst_61 [1] : vector<8x4xf32> to vector<8xf32>
    %178 = vector.shape_cast %177 : vector<8xf32> to vector<8x1xf32>
    %179 = vector.broadcast %178 : vector<8x1xf32> to vector<8x4xf32>
    %180 = arith.subf %176, %179 : vector<8x4xf32>
    %181 = math.exp %180 : vector<8x4xf32>
    %182 = arith.extui %174 : vector<8x4xi1> to vector<8x4xi32>
    %183 = arith.sitofp %182 : vector<8x4xi32> to vector<8x4xf32>
    %184 = arith.mulf %181, %183 : vector<8x4xf32>
    %cst_62 = arith.constant dense<0.000000e+00> : vector<8xf32>
    %185 = vector.multi_reduction <add>, %184, %cst_62 [1] : vector<8x4xf32> to vector<8xf32>
    %186 = vector.shape_cast %185 : vector<8xf32> to vector<8x1xf32>
    %cst_63 = arith.constant 9.99999993E-9 : f32
    %187 = vector.broadcast %cst_63 : f32 to vector<8x1xf32>
    %188 = arith.addf %186, %187 : vector<8x1xf32>
    %189 = vector.broadcast %188 : vector<8x1xf32> to vector<8x4xf32>
    %190 = arith.divf %184, %189 : vector<8x4xf32>
    %191 = vector.extract_strided_slice %190 {offsets = [0, 0], sizes = [8, 1], strides = [1, 1]} : vector<8x4xf32> to vector<8x1xf32>
    %192 = vector.extract_strided_slice %164 {offsets = [0, 0], sizes = [8, 32], strides = [1, 1]} : vector<8x128xf32> to vector<8x32xf32>
    %193 = vector.broadcast %191 : vector<8x1xf32> to vector<8x32xf32>
    %194 = arith.mulf %193, %192 : vector<8x32xf32>
    %195 = vector.extract_strided_slice %190 {offsets = [0, 1], sizes = [8, 1], strides = [1, 1]} : vector<8x4xf32> to vector<8x1xf32>
    %196 = vector.extract_strided_slice %164 {offsets = [0, 32], sizes = [8, 32], strides = [1, 1]} : vector<8x128xf32> to vector<8x32xf32>
    %197 = vector.broadcast %195 : vector<8x1xf32> to vector<8x32xf32>
    %198 = arith.mulf %197, %196 : vector<8x32xf32>
    %199 = arith.addf %194, %198 : vector<8x32xf32>
    %200 = vector.extract_strided_slice %190 {offsets = [0, 2], sizes = [8, 1], strides = [1, 1]} : vector<8x4xf32> to vector<8x1xf32>
    %201 = vector.extract_strided_slice %164 {offsets = [0, 64], sizes = [8, 32], strides = [1, 1]} : vector<8x128xf32> to vector<8x32xf32>
    %202 = vector.broadcast %200 : vector<8x1xf32> to vector<8x32xf32>
    %203 = arith.mulf %202, %201 : vector<8x32xf32>
    %204 = arith.addf %199, %203 : vector<8x32xf32>
    %205 = vector.extract_strided_slice %190 {offsets = [0, 3], sizes = [8, 1], strides = [1, 1]} : vector<8x4xf32> to vector<8x1xf32>
    %206 = vector.extract_strided_slice %164 {offsets = [0, 96], sizes = [8, 32], strides = [1, 1]} : vector<8x128xf32> to vector<8x32xf32>
    %207 = vector.broadcast %205 : vector<8x1xf32> to vector<8x32xf32>
    %208 = arith.mulf %207, %206 : vector<8x32xf32>
    %209 = arith.addf %204, %208 : vector<8x32xf32>
    %210 = arith.truncf %209 : vector<8x32xf32> to vector<8x32xbf16>
    %c0_64 = arith.constant 0 : index
    %c0_65 = arith.constant 0 : index
    %211 = vector.load %arg12[%c0_64, %c0_65] : memref<32x32xbf16, #tpu.memory_space<vmem>>, vector<32x32xbf16>
    %cst_66 = arith.constant dense<0.000000e+00> : vector<8x32xf32>
    %212 = tpu.matmul %210, %211, %cst_66 {dimension_numbers = #tpu.dot_dimension_numbers<[1], [0], [0], [1], [0, 0, 1, 1], [], []>} : vector<8x32xbf16>, vector<32x32xbf16>, vector<8x32xf32> -> vector<8x32xf32>
    %213 = arith.addf %95, %212 : vector<8x32xf32>
    %c0_67 = arith.constant 0 : index
    %c0_68 = arith.constant 0 : index
    %214 = vector.load %arg13[%c0_67, %c0_68] : memref<1x32xf32, #tpu.memory_space<vmem>>, vector<1x32xf32>
    %215 = vector.broadcast %214 : vector<1x32xf32> to vector<8x32xf32>
    %216 = arith.addf %213, %215 : vector<8x32xf32>
    %cst_69 = arith.constant 0.000000e+00 : f32
    %217 = vector.broadcast %cst_69 : f32 to vector<8x32xf32>
    %218 = arith.cmpf ogt, %216, %217 : vector<8x32xf32>
    %cst_70 = arith.constant 0.000000e+00 : f32
    %219 = vector.broadcast %cst_70 : f32 to vector<8x32xf32>
    %220 = arith.minimumf %216, %219 : vector<8x32xf32>
    %221 = math.exp %220 : vector<8x32xf32>
    %cst_71 = arith.constant 1.000000e+00 : f32
    %222 = vector.broadcast %cst_71 : f32 to vector<8x32xf32>
    %223 = arith.subf %221, %222 : vector<8x32xf32>
    %224 = arith.select %218, %216, %223 : vector<8x32xi1>, vector<8x32xf32>
    %c0_72 = arith.constant 0 : index
    %c0_73 = arith.constant 0 : index
    %225 = vector.load %arg14[%c0_72, %c0_73] : memref<8x32xf32, #tpu.memory_space<vmem>>, vector<8x32xf32>
    tpu.vector_store %arg14[%c0_72, %c0_73], %224 {strides = array<i32>} : memref<8x32xf32, #tpu.memory_space<vmem>>, vector<8x32xf32>,
    return
  }
}

</mosaic_0001>

<bundles_post_ra>
// kernel: tpu_custom_call.1
= control target key start
LH: loop header
LB: loop body
LE: loop exit
PB: predicated region body
PF: predicated region fallthrough
CT: control target
= control target key end

     0   :  { %19 = vsyncpa [#allocation3], 0  ;;  %s1433_s0 = inlined_call_operand.vmem [shape: bf16[4,8,4], index: 0, kind: input, shape index: {}]   ;;  %s1434_s1 = inlined_call_operand.hbm [shape: f32[8,8], index: 1, kind: input, shape index: {}]   ;;  %s1435_s2 = inlined_call_operand.hbm [shape: bf16[4,32], index: 2, kind: input, shape index: {}]   ;;  %s1436_s3 = inlined_call_operand.hbm [shape: f32[1,32], index: 3, kind: input, shape index: {}]   ;;  %s1437_s4 = inlined_call_operand.hbm [shape: f32[1,32], index: 4, kind: input, shape index: {}]   ;;  %s1438_s5 = inlined_call_operand.hbm [shape: f32[1,32], index: 5, kind: input, shape index: {}]   ;;  %s1439_s6 = inlined_call_operand.hbm [shape: f32[1,32], index: 6, kind: input, shape index: {}]   ;;  %s1440_s7 = inlined_call_operand.vmem [shape: bf16[32,100], index: 7, kind: input, shape index: {}]   ;;  %s1441_s8 = inlined_call_operand.hbm [shape: f32[1,100], index: 8, kind: input, shape index: {}]   ;;  %s1442_s9 = inlined_call_operand.vmem [shape: bf16[32,128], index: 9, kind: input, shape index: {}]   ;;  %s1443_s10 = inlined_call_operand.hbm [shape: bf16[128,128], index: 10, kind: input, shape index: {}]   ;;  %s1444_s11 = inlined_call_operand.vmem [shape: f32[1,128], index: 11, kind: input, shape index: {}]   ;;  %s1445_s12 = inlined_call_operand.hbm [shape: bf16[32,32], index: 12, kind: input, shape index: {}]   ;;  %s1446_s13 = inlined_call_operand.vmem [shape: f32[1,32], index: 13, kind: input, shape index: {}]   ;;  %s1447_s14 = inlined_call_operand.hbm [shape: f32[8,32], index: 14, kind: output, shape index: {}]  }
   0x1   :  { %20 = vsyncpa [#allocation6], 0 }
   0x2   :  { %21 = vsyncpa [#allocation9], 0 }
   0x3   :  { %22 = vsyncpa [#allocation12], 0 }
   0x4   :  { %23 = vsyncpa [#allocation15], 0  ;;  %s43_s15 = sshll.u32 %s1435_s2, 4  ;;  %s44_s15 = int_to_ptr.hbm [resolvable:$true] %s43_s15 }
   0x5   :  { %24 = vsyncpa [#allocation4], 0  ;;  %s1220_s16 = smov [#allocation5]   ;;  %s65_s20 = sshll.u32 %s1437_s4, 4  ;;  %s66_s20 = int_to_ptr.hbm [resolvable:$true] %s65_s20 }
   0x6   :  { %s45_s17 = sshll.u32 %s1220_s16, 4  ;;  %s1221_s21 = smov [#allocation8]   ;;  %s46_s17 = int_to_ptr.vmem [resolvable:$true] %s45_s17 }
   0x7   :  { %48 = dma.hbm_to_vmem [thread:$0]  %s44_s15, 32, %s46_s17, [#allocation6]  }
   0x8   :  { %s67_s22 = sshll.u32 %s1221_s21, 4  ;;  %s87_s25 = sshll.u32 %s1439_s6, 4  ;;  %s68_s22 = int_to_ptr.vmem [resolvable:$true] %s67_s22  ;;  %s88_s25 = int_to_ptr.hbm [resolvable:$true] %s87_s25 }
   0x9   :  { %70 = dma.hbm_to_vmem [thread:$0]  %s66_s20, 16, %s68_s22, [#allocation9]  }
   0xa   :  { %s112_s27 = sshll.u32 %s1443_s10, 4  ;;  %s1222_s28 = smov [#allocation11]   ;;  %s113_s27 = int_to_ptr.hbm [resolvable:$true] %s112_s27 }
   0xb   :  { %s89_s29 = sshll.u32 %s1222_s28, 4  ;;  %s1223_s4 = smov [#allocation14]   ;;  %s90_s29 = int_to_ptr.vmem [resolvable:$true] %s89_s29 }
   0xc   :  { %92 = dma.hbm_to_vmem [thread:$0]  %s88_s25, 16, %s90_s29, [#allocation12]  }
   0xd   :  { %s114_s30 = sshll.u32 %s1223_s4, 4  ;;  %s1224_s15 = smov 64   ;;  %s115_s30 = int_to_ptr.vmem [resolvable:$true] %s114_s30 }
   0xe   :  { %s1225_s16 = smov 4   ;;  %s32_s18 = sshll.u32 %s1434_s1, 4  ;;  %s33_s18 = int_to_ptr.hbm [resolvable:$true] %s32_s18 }
   0xf   :  { %120 = dma.hbm_to_vmem [thread:$0]  %s113_s27, 1024, %s115_s30, [#allocation15], %s1224_s15, %s1224_s15, %s1225_s16  }
  0x10   :  { %s1226_s10 = smov [#allocation2]   ;;  %s54_s22 = sshll.u32 %s1436_s3, 4  ;;  %s55_s22 = int_to_ptr.hbm [resolvable:$true] %s54_s22 }
  0x11   :  { %s34_s19 = sshll.u32 %s1226_s10, 4  ;;  %s1227_s23 = smov [#allocation7]   ;;  %s35_s19 = int_to_ptr.vmem [resolvable:$true] %s34_s19 }
  0x12   :  { %37 = dma.hbm_to_vmem [thread:$0]  %s33_s18, 128, %s35_s19, [#allocation3]  }
  0x13   :  { %s56_s24 = sshll.u32 %s1227_s23, 4  ;;  %s76_s26 = sshll.u32 %s1438_s5, 4  ;;  %s57_s24 = int_to_ptr.vmem [resolvable:$true] %s56_s24  ;;  %s77_s26 = int_to_ptr.hbm [resolvable:$true] %s76_s26 }
  0x14   :  { %59 = dma.hbm_to_vmem [thread:$0]  %s55_s22, 16, %s57_s24, [#allocation6]  }
  0x15   :  { %s100_s28 = sshll.u32 %s1441_s8, 4  ;;  %s1228_s29 = smov [#allocation10]   ;;  %s101_s28 = int_to_ptr.hbm [resolvable:$true] %s100_s28 }
  0x16   :  { %s78_s4 = sshll.u32 %s1228_s29, 4  ;;  %s1229_s3 = smov [#allocation13]   ;;  %s79_s4 = int_to_ptr.vmem [resolvable:$true] %s78_s4 }
  0x17   :  { %81 = dma.hbm_to_vmem [thread:$0]  %s77_s26, 16, %s79_s4, [#allocation9]  }
  0x18   :  { %s102_s30 = sshll.u32 %s1229_s3, 4  ;;  %s127_s18 = sshll.u32 %s1445_s12, 4  ;;  %s103_s30 = int_to_ptr.vmem [resolvable:$true] %s102_s30  ;;  %s128_s18 = int_to_ptr.hbm [resolvable:$true] %s127_s18 }
  0x19   :  { %105 = dma.hbm_to_vmem [thread:$0]  %s101_s28, 16, %s103_s30, [#allocation12]  }
  0x1a   :  { %s1230_s5 = smov [#allocation16]  }
  0x1b   :  { %s129_s10 = sshll.u32 %s1230_s5, 4  ;;  %s130_s10 = int_to_ptr.vmem [resolvable:$true] %s129_s10 }
  0x1c   :  { %135 = dma.hbm_to_vmem [thread:$0]  %s128_s18, 256, %s130_s10, [#allocation15], %s1224_s15, %s1224_s15, %s1225_s16  }
  0x1d   :  { %1208 = dma.done.wait [#allocation3], 128  }
  0x1e   :  { %1209 = vsyncadd [#allocation3], 4294967168 }
  0x1f   :  { %1210 = dma.done.wait [#allocation6], 48  }
  0x20   :  { %1211 = vsyncadd [#allocation6], 4294967248 }
  0x21   :  { %1212 = dma.done.wait [#allocation9], 32  }
  0x22   :  { %1213 = vsyncadd [#allocation9], 4294967264 }
  0x23   :  { %1214 = dma.done.wait [#allocation12], 32  }
  0x24   :  { %1215 = vsyncadd [#allocation12], 4294967264 }
  0x25   :  { %1216 = dma.done.wait [#allocation15], 1280  }
  0x26   :  { %1217 = vsyncadd [#allocation15], 4294966016  ;;  %vm201_vm0 = vcmask 1041408   ;;  %v179_v0 = vld [vmem:[#allocation5] sm:$0x3]  ;;  %v876_v2 = vld [vmem:[%s1433_s0] sm:$0xff] }
  0x27   :  { %v203_v1 = vsel %vm201_vm0, %v179_v0, 0  ;;  %vm194_vm1 = vcmask 31744   ;;  %v877_v3 = vld [vmem:[%s1433_s0 + $0x8] sm:$0xff]  ;;  %vm233_vm2 = vcmask 261120   ;;  %v1231_v59 = vmov 32.0   ;;  %s1232_s2 = smov 96  }
  0x28   :  { %212 = vmatpush.bf16.msra.mxu0 %v203_v1  ;;  %v918_v4 = vld [vmem:[#allocation7] ss:$0 sm:$0xff]  ;;  %v919_v7 = vld [vmem:[#allocation8] ss:$0 sm:$0xff]  ;;  %vm415_vm10 = vcmask 64512   ;;  %vm645_vm0 = vcmask 818944  }
  0x29   :  { %s787_s3 = sshll.u32 %s1447_s14, 4  ;;  %s788_s3 = int_to_ptr.hbm [resolvable:$true] %s787_s3 }
  0x2b   :  { %809 = vmatmul.msk.bf16.vlgmr.msra.gmra.mxu0 %vm194_vm1, %v876_v2 }
  0x3b   :  { %810 = vmatmul.msk.bf16.gmra.mxu0 %vm194_vm1, %v877_v3 }
  0xa8   :  { %v214_v5 = vpop.f32.mrf.mxu0 }
  0xa9   :  { %v215_v6 = vadd.f32 %v918_v4, %v214_v5 }
  0xab   :  { %924 = vtanh.f32 %v215_v6 }
  0xb0   :  { %v216_v8 = vpop.f32.mrf.mxu0 }
  0xb1   :  { %v925_v9 = vpop.eup %924  ;;  %v217_v10 = vadd.f32 %v918_v4, %v216_v8  ;;  %v878_v8 = vld [vmem:[%s1440_s7] sm:$0xff] }
  0xb2   :  { %v232_v11 = vmul.f32 %v925_v9, %v919_v7 }
  0xb3   :  { %926 = vtanh.f32 %v217_v10 }
  0xb4   :  { %v234_v12 = vsel %vm233_vm2, %v232_v11, 0.0 }
  0xb5   :  { %235 = vadd.xlane.f32.xlu0 %v234_v12 }
  0xb8   :  { %v219_v13 = vpop.f32.mrf.mxu0 }
  0xb9   :  { %v927_v14 = vpop.eup %926  ;;  %v220_v15 = vadd.f32 %v918_v4, %v219_v13 }
  0xba   :  { %v237_v16 = vmul.f32 %v927_v14, %v919_v7 }
  0xbb   :  { %928 = vtanh.f32 %v220_v15 }
  0xbc   :  { %v238_v17 = vsel %vm233_vm2, %v237_v16, 0.0 }
  0xbd   :  { %239 = vadd.xlane.f32.xlu0 %v238_v17 }
  0xc0   :  { %v221_v18 = vpop.f32.mrf.mxu0 }
  0xc1   :  { %v929_v19 = vpop.eup %928  ;;  %v222_v20 = vadd.f32 %v918_v4, %v221_v18 }
  0xc2   :  { %v241_v21 = vmul.f32 %v929_v19, %v919_v7 }
  0xc3   :  { %930 = vtanh.f32 %v222_v20 }
  0xc4   :  { %v242_v22 = vsel %vm233_vm2, %v241_v21, 0.0 }
  0xc5   :  { %243 = vadd.xlane.f32.xlu1 %v242_v22 }
  0xc9   :  { %v931_v23 = vpop.eup %930 }
  0xca   :  { %v245_v24 = vmul.f32 %v931_v23, %v919_v7  ;;  %v879_v7 = vld [vmem:[%s1440_s7 + $0x8] sm:$0xff] }
  0xcb   :  { %362 = vmatpush.bf16.msra.mxu1 %v879_v7 }
  0xcc   :  { %v246_v25 = vsel %vm233_vm2, %v245_v24, 0.0 }
  0xcd   :  { %247 = vadd.xlane.f32.xlu1 %v246_v25 }
  0xcf   :  { %363 = vmatpush.bf16.msra.mxu1 %v878_v8 }
 0x128   :  { %v236_v26 = vpop.xlane.xlu0 %235 }
 0x130   :  { %v240_v28 = vpop.xlane.xlu0 %239 }
 0x131   :  { %v249_v29 = vmax.f32 %v236_v26, %v240_v28 }
 0x138   :  { %v244_v27 = vpop.xlane.xlu1 %243 }
 0x139   :  { %v250_v30 = vmax.f32 %v249_v29, %v244_v27 }
 0x140   :  { %v248_v31 = vpop.xlane.xlu1 %247 }
 0x141   :  { %v251_v32 = vmax.f32 %v250_v30, %v248_v31 }
 0x143   :  { %v252_v33 = vsub.f32 %v236_v26, %v251_v32  ;;  %v255_v34 = vsub.f32 %v240_v28, %v251_v32  ;;  %v258_v35 = vsub.f32 %v244_v27, %v251_v32  ;;  %v261_v36 = vsub.f32 %v248_v31, %v251_v32  ;;  %v920_v26 = vld [vmem:[#allocation10] ss:$0 sm:$0xff] }
 0x145   :  { %v253_v37 = vmul.f32 1.442695, %v252_v33  ;;  %v256_v38 = vmul.f32 1.442695, %v255_v34  ;;  %v259_v39 = vmul.f32 1.442695, %v258_v35 }
 0x146   :  { %v262_v40 = vmul.f32 1.442695, %v261_v36  ;;  %v921_v33 = vld [vmem:[#allocation11] ss:$0 sm:$0xff] }
 0x147   :  { %932 = vpow2.f32 %v253_v37 }
 0x148   :  { %934 = vpow2.f32 %v256_v38  ;;  %v881_v38 = vld [vmem:[%s1442_s9 + $0x8] sm:$0xff] }
 0x149   :  { %936 = vpow2.f32 %v259_v39  ;;  %506 = vmatpush.bf16.msra.mxu3 %v881_v38  ;;  %v880_v39 = vld [vmem:[%s1442_s9] sm:$0xff] }
 0x14a   :  { %938 = vpow2.f32 %v262_v40  ;;  %v922_v40 = vld [vmem:[#allocation13] ss:$0 sm:$0xff] }
 0x14d   :  { %v933_v41 = vpop.eup %932  ;;  %507 = vmatpush.bf16.msra.mxu3 %v880_v39 }
 0x14e   :  { %v935_v42 = vpop.eup %934  ;;  %v264_v45 = vmul.f32 %v933_v41, %v925_v9 }
 0x14f   :  { %v265_v43 = vadd.f32 %v935_v42, %v933_v41  ;;  %v937_v44 = vpop.eup %936  ;;  %v266_v46 = vmul.f32 %v935_v42, %v927_v14 }
 0x150   :  { %v939_v48 = vpop.eup %938  ;;  %v269_v52 = vmul.f32 %v937_v44, %v929_v19 }
 0x151   :  { %v268_v47 = vadd.f32 %v937_v44, %v265_v43  ;;  %v267_v50 = vadd.f32 %v266_v46, %v264_v45  ;;  %v272_v54 = vmul.f32 %v939_v48, %v931_v23 }
 0x153   :  { %v271_v49 = vadd.f32 %v939_v48, %v268_v47  ;;  %v270_v53 = vadd.f32 %v269_v52, %v267_v50  ;;  %v1233_v47 = vmov 5.656854   ;;  %v1383_v52 = vld [vmem:[#allocation2] sm:$0xff] }
 0x155   :  { %v274_v51 = vadd.f32 1e-08, %v271_v49  ;;  %v273_v55 = vadd.f32 %v272_v54, %v270_v53  ;;  %v436_v53 = vand.u32 2147483647, %v1383_v52 }
 0x157   :  { %940 = vrcp.f32 %v274_v51  ;;  %v437_v54 = vsel %vm415_vm10, %v436_v53, 0.0  ;;  %v888_v53 = vld [vmem:[#allocation14 + $0x30] sm:$0xff] }
 0x158   :  { %942 = vrcp.f32 %v1231_v59 }
 0x15d   :  { %v941_v56 = vpop.eup %940 }
 0x15e   :  { %v276_v57 = vmul.f32 %v941_v56, %v273_v55  ;;  %v943_v60 = vpop.eup %942 }
 0x15f   :  { %v281_v61 = vmul.f32 32.0, %v943_v60  ;;  %vm285_vm3 = vweird.f32 %v943_v60 }
 0x160   :  { %v277_v58 = vsel %vm233_vm2, %v276_v57, 0.0 }
 0x161   :  { %278 = vadd.xlane.f32.xlu2 %v277_v58  ;;  %v282_v62 = vsub.f32 1.0, %v281_v61 }
 0x163   :  { %v283_v63 = vmul.f32 %v943_v60, %v282_v62 }
 0x165   :  { %v284_v0 = vadd.f32 %v943_v60, %v283_v63 }
 0x167   :  { %v286_v1 = vsel %vm285_vm3, %v943_v60, %v284_v0  ;;  %vm517_vm3 = vcmask 1043456  }
 0x1d4   :  { %v279_v2 = vpop.xlane.xlu2 %278 }
 0x1d5   :  { %v287_v3 = vmul.f32 %v286_v1, %v279_v2 }
 0x1d7   :  { %v288_v4 = vsub.f32 %v276_v57, %v287_v3 }
 0x1d9   :  { %v289_v5 = vmul.f32 %v288_v4, %v288_v4  ;;  %v298_v31 = vmul.f32 %v920_v26, %v288_v4 }
 0x1db   :  { %v290_v6 = vsel %vm233_vm2, %v289_v5, 0.0 }
 0x1dc   :  { %291 = vadd.xlane.f32.xlu2 %v290_v6 }
 0x1e4   :  { %438 = vadd.xlane.f32.xlu2 %v437_v54 }
 0x24f   :  { %v292_v9 = vpop.xlane.xlu2 %291 }
 0x250   :  { %v293_v10 = vmul.f32 %v292_v9, %v286_v1 }
 0x252   :  { %v299_v11 = vadd.f32 1e-05, %v293_v10 }
 0x254   :  { %944 = vrsqrt.f32 %v299_v11  ;;  %vm307_vm4 = vcmp.eq.f32.partialorder %v299_v11, inf  ;;  %v310_v19 = vand.u32 2147483648, %v299_v11  ;;  %vm309_vm5 = vcmp.eq.f32.partialorder %v299_v11, 0.0 }
 0x25a   :  { %v945_v12 = vpop.eup %944 }
 0x25b   :  { %v301_v13 = vmul.f32 %v945_v12, %v299_v11 }
 0x25d   :  { %v302_v14 = vmul.f32 %v945_v12, %v301_v13 }
 0x25f   :  { %v303_v15 = vmul.f32 0.5, %v302_v14 }
 0x261   :  { %v304_v16 = vsub.f32 1.5, %v303_v15 }
 0x263   :  { %v305_v17 = vmul.f32 %v945_v12, %v304_v16 }
 0x265   :  { %v306_v18 = vmul.f32 %v305_v17, %v299_v11 }
 0x267   :  { %v308_v20 = vsel %vm307_vm4, %v299_v11, %v306_v18  ;;  %v439_v18 = vpop.xlane.xlu2 %438 }
 0x268   :  { %v311_v21 = vsel %vm309_vm5, %v310_v19, %v308_v20  ;;  %v440_v19 = vadd.f32 1e-08, %v439_v18 }
 0x269   :  { %946 = vrcp.f32 %v311_v21  ;;  %v323_v25 = vand.u32 2147483648, %v311_v21  ;;  %v321_v28 = vand.u32 2147483647, %v311_v21  ;;  %vm317_vm7 = vweird.f32 %v311_v21 }
 0x26a   :  { %948 = vrcp.f32 %v1233_v47  ;;  %vm446_vm4 = vweird.f32 %v440_v19  ;;  %v452_v26 = vand.u32 2147483648, %v440_v19 }
 0x26b   :  { %v324_v30 = vor.u32 1.1754944e-38, %v323_v25  ;;  %vm322_vm9 = vcmp.eq.f32.partialorder %v321_v28, 8.507059e+37 }
 0x26f   :  { %v947_v22 = vpop.eup %946 }
 0x270   :  { %v313_v23 = vmul.f32 %v947_v22, %v311_v21  ;;  %vm318_vm6 = vweird.f32 %v947_v22  ;;  %v949_v49 = vpop.eup %948 }
 0x271   :  { %vm319_vm8 = vmor %vm317_vm7, %vm318_vm6  ;;  %v388_v50 = vmul.f32 5.656854, %v949_v49  ;;  %vm392_vm11 = vweird.f32 %v949_v49 }
 0x272   :  { %v314_v24 = vsub.f32 1.0, %v313_v23 }
 0x273   :  { %v389_v51 = vsub.f32 1.0, %v388_v50  ;;  %v889_v50 = vld [vmem:[#allocation14 + $0x38] sm:$0xff] }
 0x274   :  { %v315_v27 = vmul.f32 %v947_v22, %v314_v24  ;;  %610 = vmatpush.bf16.msrb.mxu0 %v889_v50 }
 0x275   :  { %v390_v55 = vmul.f32 %v949_v49, %v389_v51 }
 0x276   :  { %v316_v29 = vadd.f32 %v947_v22, %v315_v27  ;;  %v450_v27 = vand.u32 2147483647, %v440_v19 }
 0x277   :  { %v391_v56 = vadd.f32 %v949_v49, %v390_v55  ;;  %v887_v55 = vld [vmem:[#allocation14 + $0x28] sm:$0xff] }
 0x278   :  { %v320_v32 = vsel %vm319_vm8, %v947_v22, %v316_v29  ;;  %vm451_vm8 = vcmp.eq.f32.partialorder %v450_v27, 8.507059e+37  ;;  %611 = vmatpush.bf16.msrb.mxu0 %v888_v53 }
 0x279   :  { %v325_v34 = vsel %vm322_vm9, %v324_v30, %v320_v32  ;;  %v393_v57 = vsel %vm392_vm11, %v949_v49, %v391_v56  ;;  %v457_v49 = vld [vmem:[%s1444_s11] sm:$0x1]  ;;  %s1235_s11 = smov 32  }
 0x27a   :  { %v326_v35 = vmul.f32 %v325_v34, %v298_v31  ;;  %v458_v51 = vsub.f32 0.0, %v457_v49 }
 0x27c   :  { %v331_v36 = vadd.f32 %v921_v33, %v326_v35  ;;  %v453_v33 = vor.u32 1.1754944e-38, %v452_v26  ;;  %v459_v54 = vmul.f32 1.442695, %v458_v51  ;;  %612 = vmatpush.bf16.msrb.mxu0 %v887_v55  ;;  %v1239_v51 = vmov 96  }
 0x27e   :  { %v332_v37 = vpack.c.bf16 %v331_v36, %v331_v36 }
 0x280   :  { %819 = vmatmul.msk.bf16.vlgmr.msra.gmra.mxu1 %vm233_vm2, %v332_v37 }
 0x2fd   :  { %v365_v41 = vpop.f32.mrf.mxu1 }
 0x2fe   :  { %v1376_v42 = vadd.f32 %v922_v40, %v365_v41 }
 0x300   :  { %v369_v43 = vmax.f32 %v1376_v42, 0.0  ;;  %v646_v13 = vsel %vm645_vm0, %v1376_v42, -inf }
 0x302   :  { %v370_v44 = vpack.c.bf16 %v369_v43, %v369_v43 }
 0x304   :  { %483 = vrot.lane.b32.xlu0 %v370_v44, %s1232_s2  ;;  %v372_v45 = vsel %vm233_vm2, %v370_v44, 0 }
 0x305   :  { %v367_v46 = vpop.f32.mrf.mxu1  ;;  %381 = vmatpush.bf16.xpose.msra.mxu2 %v372_v45 }
 0x30c   :  { %820 = vmatmul.msk.bf16.vlgmr.msra.gmra.mxu2 %vm233_vm2, %v370_v44 }
 0x376   :  { %v484_v48 = vpop.permute.xlu0 %483 }
 0x377   :  { %830 = vmatmul.msk.bf16.vlgmr.msra.gmra.mxu3 %vm233_vm2, %v484_v48 }
 0x38f   :  { %v383_v58 = vpop.f32.mrf.mxu2 }
 0x390   :  { %v394_v59 = vmul.f32 %v393_v57, %v383_v58  ;;  %v885_v58 = vld [vmem:[#allocation14 + $0x18] sm:$0xff] }
 0x392   :  { %v821_v60 = vadd.f32 -1.0, %v394_v59  ;;  %v884_v59 = vld [vmem:[#allocation14 + $0x10] sm:$0xff] }
 0x394   :  { %v396_v61 = vsub.f32 0.0, %v821_v60 }
 0x396   :  { %v397_v62 = vmul.f32 1.442695, %v396_v61 }
 0x397   :  { %v385_v63 = vpop.f32.mrf.mxu2 }
 0x398   :  { %950 = vpow2.f32 %v397_v62  ;;  %v883_v62 = vld [vmem:[#allocation14 + $0x8] sm:$0xff] }
 0x39e   :  { %v951_v0 = vpop.eup %950 }
 0x39f   :  { %v399_v1 = vadd.f32 1.0, %v951_v0 }
 0x3a1   :  { %952 = vrcp.f32 %v399_v1  ;;  %v411_v5 = vand.u32 2147483648, %v399_v1  ;;  %v409_v7 = vand.u32 2147483647, %v399_v1  ;;  %vm405_vm13 = vweird.f32 %v399_v1 }
 0x3a2   :  { %954 = vrcp.f32 %v440_v19 }
 0x3a3   :  { %v412_v9 = vor.u32 1.1754944e-38, %v411_v5  ;;  %vm410_vm15 = vcmp.eq.f32.partialorder %v409_v7, 8.507059e+37 }
 0x3a7   :  { %v953_v2 = vpop.eup %952 }
 0x3a8   :  { %v401_v3 = vmul.f32 %v953_v2, %v399_v1  ;;  %vm406_vm12 = vweird.f32 %v953_v2  ;;  %v955_v20 = vpop.eup %954 }
 0x3a9   :  { %vm407_vm14 = vmor %vm405_vm13, %vm406_vm12  ;;  %v442_v21 = vmul.f32 %v955_v20, %v440_v19  ;;  %vm447_vm5 = vweird.f32 %v955_v20 }
 0x3aa   :  { %v402_v4 = vsub.f32 1.0, %v401_v3  ;;  %vm448_vm6 = vmor %vm446_vm4, %vm447_vm5 }
 0x3ab   :  { %v443_v23 = vsub.f32 1.0, %v442_v21 }
 0x3ac   :  { %v403_v6 = vmul.f32 %v953_v2, %v402_v4 }
 0x3ad   :  { %v444_v25 = vmul.f32 %v955_v20, %v443_v23 }
 0x3ae   :  { %v404_v8 = vadd.f32 %v953_v2, %v403_v6 }
 0x3af   :  { %v445_v29 = vadd.f32 %v955_v20, %v444_v25  ;;  %v1234_v25 = vmov 0.0  }
 0x3b0   :  { %v408_v10 = vsel %vm407_vm14, %v953_v2, %v404_v8  ;;  %v882_v2 = vld [vmem:[#allocation14] sm:$0xff] }
 0x3b1   :  { %v413_v11 = vsel %vm410_vm15, %v412_v9, %v408_v10  ;;  %v449_v36 = vsel %vm448_vm6, %v955_v20, %v445_v29 }
 0x3b2   :  { %v416_v12 = vsel %vm415_vm10, %v413_v11, 0.0  ;;  %v454_v40 = vsel %vm451_vm8, %v453_v33, %v449_v36  ;;  %v1238_v36 = vmov 99  }
 0x3b3   :  { %417 = vadd.xlane.f32.xlu1 %v416_v12  ;;  %v455_v45 = vmul.f32 %v454_v40, %v1383_v52  ;;  %v886_v52 = vld [vmem:[#allocation14 + $0x20] sm:$0xff]  ;;  %917 = vset.pattern.permute.xlu0 %v1238_v36 }
 0x3b4   :  { %613 = vmatpush.bf16.msrb.mxu0 %v886_v52 }
 0x3b8   :  { %614 = vmatpush.bf16.msrb.mxu0 %v885_v58 }
 0x3bb   :  { %647 = vmax.xlane.f32.xlu1 %v646_v13 }
 0x3bc   :  { %615 = vmatpush.bf16.msrb.mxu0 %v884_v59 }
 0x3c0   :  { %616 = vmatpush.bf16.msrb.mxu0 %v883_v62 }
 0x3c4   :  { %617 = vmatpush.bf16.msrb.mxu0 %v882_v2  ;;  %v923_v2 = vld [vmem:[%s1446_s13] ss:$0 sm:$0xff]  ;;  %s1240_s13 = smov [#allocation17]  }
 0x3c5   :  { %s785_s28 = sshll.u32 %s1240_s13, 4  ;;  %s786_s28 = int_to_ptr.vmem [resolvable:$true] %s785_s28 }
 0x3fa   :  { %v509_v14 = vpop.f32.mrf.mxu3 }
 0x3fb   :  { %v513_v15 = vpack.c.bf16 %v509_v14, %v509_v14 }
 0x3fd   :  { %v519_v16 = vsel %vm517_vm3, %v513_v15, 0 }
 0x3fe   :  { %528 = vmatpush.bf16.msrb.mxu1 %v519_v16 }
 0x402   :  { %v511_v17 = vpop.f32.mrf.mxu3 }
 0x426   :  { %v418_v22 = vpop.xlane.xlu1 %417 }
 0x427   :  { %v419_v24 = vadd.f32 1e-08, %v418_v22 }
 0x429   :  { %956 = vrcp.f32 %v419_v24  ;;  %v431_v37 = vand.u32 2147483648, %v419_v24  ;;  %v429_v39 = vand.u32 2147483647, %v419_v24  ;;  %vm425_vm11 = vweird.f32 %v419_v24 }
 0x42a   :  { %958 = vpow2.f32 %v459_v54 }
 0x42b   :  { %v432_v43 = vor.u32 1.1754944e-38, %v431_v37  ;;  %vm430_vm13 = vcmp.eq.f32.partialorder %v429_v39, 8.507059e+37 }
 0x42e   :  { %v648_v28 = vpop.xlane.xlu1 %647 }
 0x42f   :  { %v957_v30 = vpop.eup %956  ;;  %vm649_vm7 = vcmp.ge.f32.partialorder %v1376_v42, %v648_v28 }
 0x430   :  { %v421_v31 = vmul.f32 %v957_v30, %v419_v24  ;;  %v650_v32 = vsel %vm649_vm7, -1e+30, %v1376_v42  ;;  %vm426_vm9 = vweird.f32 %v957_v30  ;;  %v959_v56 = vpop.eup %958 }
 0x431   :  { %v651_v34 = vsel %vm645_vm0, %v650_v32, -inf  ;;  %vm427_vm12 = vmor %vm425_vm11, %vm426_vm9  ;;  %v461_v57 = vadd.f32 1.0, %v959_v56 }
 0x432   :  { %v422_v35 = vsub.f32 1.0, %v421_v31  ;;  %652 = vmax.xlane.f32.xlu2 %v651_v34  ;;  %v1236_v34 = vmov 98  }
 0x433   :  { %960 = vrcp.f32 %v461_v57  ;;  %vm467_vm15 = vweird.f32 %v461_v57  ;;  %v473_v5 = vand.u32 2147483648, %v461_v57  ;;  %v471_v7 = vand.u32 2147483647, %v461_v57  ;;  %914 = vset.pattern.permute.xlu2 %v1236_v34 }
 0x434   :  { %v423_v38 = vmul.f32 %v957_v30, %v422_v35  ;;  %v1237_v35 = vmov 97  }
 0x435   :  { %v474_v8 = vor.u32 1.1754944e-38, %v473_v5  ;;  %vm472_vm6 = vcmp.eq.f32.partialorder %v471_v7, 8.507059e+37  ;;  %913 = vset.pattern.permute.xlu1 %v1237_v35 }
 0x436   :  { %v424_v41 = vadd.f32 %v957_v30, %v423_v38 }
 0x438   :  { %v428_v44 = vsel %vm427_vm12, %v957_v30, %v424_v41 }
 0x439   :  { %v433_v46 = vsel %vm430_vm13, %v432_v43, %v428_v44  ;;  %v961_v60 = vpop.eup %960 }
 0x43a   :  { %v434_v47 = vmul.f32 %v433_v46, %v413_v11  ;;  %v463_v1 = vmul.f32 %v961_v60, %v461_v57  ;;  %vm468_vm4 = vweird.f32 %v961_v60 }
 0x43b   :  { %vm469_vm5 = vmor %vm467_vm15, %vm468_vm4 }
 0x43c   :  { %v1395_v48 = vpack.c.bf16 %v434_v47, %v455_v45  ;;  %v464_v3 = vsub.f32 1.0, %v463_v1  ;;  %v890_v1 = vld [vmem:[#allocation16] sm:$0xff] }
 0x43e   :  { %831 = vmatmul.msk.bf16.vlgmr.msrb.gmra.mxu1 %vm415_vm10, %v1395_v48  ;;  %v465_v4 = vmul.f32 %v961_v60, %v464_v3 }
 0x440   :  { %v466_v6 = vadd.f32 %v961_v60, %v465_v4 }
 0x442   :  { %v470_v9 = vsel %vm469_vm5, %v961_v60, %v466_v6  ;;  %v891_v60 = vld [vmem:[#allocation16 + $0x8] sm:$0xff] }
 0x443   :  { %v1407_v10 = vsel %vm472_vm6, %v474_v8, %v470_v9  ;;  %750 = vmatpush.bf16.msrb.mxu3 %v891_v60 }
 0x444   :  { %v477_v12 = vsub.f32 1.0, %v1407_v10  ;;  %v536_v13 = vperm.slane %v1407_v10, 0 }
 0x446   :  { %v540_v14 = vperm.slane %v477_v12, 0 }
 0x447   :  { %751 = vmatpush.bf16.msrb.mxu3 %v890_v1 }
 0x4a5   :  { %v653_v61 = vpop.xlane.xlu2 %652 }
 0x4a6   :  { %vm654_vm14 = vcmp.ge.f32.partialorder %v1376_v42, %v653_v61 }
 0x4a7   :  { %v655_v63 = vsel %vm654_vm14, %v1376_v42, -1e+30  ;;  %v865_v26 = vsel %vm654_vm14, 1.0, %v1234_v25 }
 0x4a8   :  { %v656_v0 = vsel %vm645_vm0, %v655_v63, -inf }
 0x4a9   :  { %657 = vmax.xlane.f32.xlu1 %v656_v0 }
 0x4bb   :  { %v530_v11 = vpop.f32.mrf.mxu1 }
 0x4bc   :  { %v538_v16 = vmul.f32 %v536_v13, %v530_v11 }
 0x4c3   :  { %v532_v15 = vpop.f32.mrf.mxu1 }
 0x4c4   :  { %v542_v17 = vmul.f32 %v540_v14, %v532_v15 }
 0x4c6   :  { %v543_v18 = vadd.f32 %v542_v17, %v538_v16 }
 0x4c8   :  { %v544_v19 = vmax.f32 %v543_v18, 0.0 }
 0x4ca   :  { %v545_v20 = vpack.c.bf16 %v544_v19, %v544_v19 }
 0x4cc   :  { %618 = vmatmul.bf16.vlgmr.msrb.gmra.mxu0 %v545_v20 }
 0x51c   :  { %v658_v21 = vpop.xlane.xlu1 %657 }
 0x51d   :  { %v659_v22 = vsub.f32 %v655_v63, %v658_v21 }
 0x51f   :  { %v660_v23 = vmul.f32 1.442695, %v659_v22 }
 0x521   :  { %962 = vpow2.f32 %v660_v23 }
 0x527   :  { %v963_v24 = vpop.eup %962 }
 0x528   :  { %v664_v27 = vmul.f32 %v963_v24, %v865_v26 }
 0x52a   :  { %666 = vrot.lane.b32.xlu2 %v664_v27, %s1235_s11 }
 0x549   :  { %v619_v28 = vpop.f32.mrf.mxu0 }
 0x54a   :  { %v623_v29 = vpack.c.bf16 %v619_v28, %v619_v28 }
 0x54c   :  { %v625_v30 = vsel %vm517_vm3, %v623_v29, 0 }
 0x54d   :  { %634 = vmatpush.bf16.msrb.mxu2 %v625_v30 }
 0x550   :  { %864 = vmatmul.msk.bf16.vlgmr.msrb.gmra.mxu2 %vm415_vm10, %v1395_v48 }
 0x551   :  { %v621_v31 = vpop.f32.mrf.mxu0 }
 0x584   :  { %v667_v32 = vpop.permute.xlu2 %666 }
 0x585   :  { %v669_v33 = vsel %vm194_vm1, %v667_v32, 0.0 }
 0x586   :  { %670 = vadd.xlane.f32.xlu0 %v669_v33 }
 0x5d3   :  { %v636_v53 = vpop.f32.mrf.mxu2 }
 0x5d4   :  { %v641_v52 = vmul.f32 %v636_v53, %v536_v13 }
 0x5db   :  { %v638_v54 = vpop.f32.mrf.mxu2 }
 0x5dc   :  { %v642_v55 = vmul.f32 %v638_v54, %v540_v14 }
 0x5de   :  { %v643_v56 = vadd.f32 %v642_v55, %v641_v52 }
 0x5e0   :  { %v644_v57 = vmax.f32 %v643_v56, 0.0 }
 0x5f9   :  { %v671_v37 = vpop.xlane.xlu0 %670 }
 0x5fa   :  { %v672_v38 = vadd.f32 1e-08, %v671_v37 }
 0x5fc   :  { %964 = vrcp.f32 %v672_v38  ;;  %v684_v43 = vand.u32 2147483648, %v672_v38  ;;  %v682_v45 = vand.u32 2147483647, %v672_v38  ;;  %vm678_vm0 = vweird.f32 %v672_v38 }
 0x5fe   :  { %v685_v47 = vor.u32 1.1754944e-38, %v684_v43  ;;  %vm683_vm3 = vcmp.eq.f32.partialorder %v682_v45, 8.507059e+37 }
 0x602   :  { %v965_v39 = vpop.eup %964 }
 0x603   :  { %v674_v40 = vmul.f32 %v965_v39, %v672_v38  ;;  %vm679_vm10 = vweird.f32 %v965_v39 }
 0x604   :  { %vm680_vm1 = vmor %vm678_vm0, %vm679_vm10 }
 0x605   :  { %v675_v41 = vsub.f32 1.0, %v674_v40 }
 0x607   :  { %v676_v44 = vmul.f32 %v965_v39, %v675_v41 }
 0x609   :  { %v677_v46 = vadd.f32 %v965_v39, %v676_v44 }
 0x60b   :  { %v681_v48 = vsel %vm680_vm1, %v965_v39, %v677_v46 }
 0x60c   :  { %v686_v49 = vsel %vm683_vm3, %v685_v47, %v681_v48 }
 0x60d   :  { %v687_v50 = vmul.f32 %v686_v49, %v664_v27 }
 0x60f   :  { %705 = vperm.xlu2 %914, %v687_v50   ;;  %695 = vperm.xlu1 %913, %v687_v50  }
 0x617   :  { %915 = vset.pattern.permute.xlu2 %v1238_v36  ;;  %916 = vset.pattern.permute.xlu1 %v1239_v51 }
 0x618   :  { %715 = vperm.xlu2 %915, %v687_v50   ;;  %690 = vperm.xlu1 %916, %v687_v50  }
 0x669   :  { %v706_v58 = vpop.permute.xlu2 %705 }
 0x66a   :  { %v708_v59 = vmul.f32 %v706_v58, %v644_v57 }
 0x66c   :  { %710 = vrot.lane.b32.xlu1 %v708_v59, %s1224_s15 }
 0x672   :  { %v716_v61 = vpop.permute.xlu2 %715 }
 0x673   :  { %v718_v62 = vmul.f32 %v716_v61, %v644_v57 }
 0x674   :  { %765 = vrot.lane.b32.xlu1 %v923_v2, %s1224_s15 }
 0x675   :  { %720 = vrot.lane.b32.xlu0 %v718_v62, %s1235_s11 }
 0x681   :  { %v696_v63 = vpop.permute.xlu1 %695 }
 0x682   :  { %v698_v0 = vmul.f32 %v696_v63, %v644_v57 }
 0x684   :  { %700 = vrot.lane.b32.xlu2 %v698_v0, %s1232_s2 }
 0x68a   :  { %v691_v3 = vpop.permute.xlu1 %690 }
 0x68b   :  { %v693_v5 = vmul.f32 %v691_v3, %v644_v57 }
 0x6de   :  { %v701_v4 = vpop.permute.xlu2 %700  ;;  %v711_v7 = vpop.permute.xlu1 %710 }
 0x6df   :  { %v703_v6 = vadd.f32 %v701_v4, %v693_v5 }
 0x6e1   :  { %v713_v8 = vadd.f32 %v711_v7, %v703_v6 }
 0x6e6   :  { %v766_v15 = vpop.permute.xlu1 %765 }
 0x6e7   :  { %v721_v9 = vpop.permute.xlu0 %720 }
 0x6e8   :  { %v723_v10 = vadd.f32 %v721_v9, %v713_v8 }
 0x6ea   :  { %v724_v11 = vpack.c.bf16 %v723_v10, %v723_v10 }
 0x6ec   :  { %874 = vmatmul.msk.bf16.vlgmr.msrb.gmra.mxu3 %vm233_vm2, %v724_v11 }
 0x76f   :  { %v753_v12 = vpop.f32.mrf.mxu3 }
 0x770   :  { %758 = vrot.lane.b32.xlu2 %v753_v12, %s1224_s15 }
 0x777   :  { %v755_v13 = vpop.f32.mrf.mxu3 }
 0x7ca   :  { %v759_v14 = vpop.permute.xlu2 %758 }
 0x7cb   :  { %v761_v16 = vadd.f32 %v759_v14, %v1376_v42 }
 0x7cd   :  { %v768_v17 = vadd.f32 %v766_v15, %v761_v16 }
 0x7cf   :  { %v770_v18 = vmin.f32 %v768_v17, 0.0  ;;  %vm769_vm7 = vcmp.gt.f32.partialorder %v768_v17, 0.0 }
 0x7d1   :  { %v771_v19 = vmul.f32 1.442695, %v770_v18 }
 0x7d3   :  { %966 = vpow2.f32 %v771_v19 }
 0x7d9   :  { %v967_v20 = vpop.eup %966 }
 0x7da   :  { %v875_v21 = vadd.f32 -1.0, %v967_v20 }
 0x7dc   :  { %v774_v22 = vsel %vm769_vm7, %v768_v17, %v875_v21 }
 0x7dd   :  { %776 = vrot.lane.b32.xlu2 %v774_v22, %s1224_s15 }
 0x837   :  { %v777_v23 = vpop.permute.xlu2 %776 }
 0x838   :  { %779 = vst.msk [vmem:[#allocation17] sm:$0xff] %vm233_vm2, %v777_v23 }
 0x839   :  { %790 = dma.vmem_to_hbm [thread:$0]  %s786_s28, 128, %s788_s3, [#allocation4]  }
 0x83a   :  { %1218 = dma.done.wait [#allocation4], 128  }
 0x83b   :  { %1219 = vsyncadd [#allocation4], 4294967168 }
 0x83c   :  { %795 = vsyncpa [#allocation3], 1 }
 0x83d   :  { %796 = vsyncpa [#allocation6], 1 }
 0x83e   :  { %797 = vsyncpa [#allocation9], 1 }
 0x83f   :  { %798 = vsyncpa [#allocation12], 1 }
 0x840   :  { %799 = vsyncpa [#allocation15], 1 }
 0x841   :  { %800 = vsyncpa [#allocation4], 1 }

</bundles_post_ra>
